<compile_context>
chip_gen: v5e
topology: v5e:2x2
jax: 0.10.0
libtpu: 0.0.40
codegen_flags: <defaults>
</compile_context>

<pallas_src>
import functools

import jax
import jax.numpy as jnp
from jax.experimental import pallas as pl
from jax.experimental.pallas import tpu as pltpu


def _pair(v):
    return (v, v) if isinstance(v, int) else tuple(v)


def _quadruple(v):
    return (v, v, v, v) if isinstance(v, int) else tuple(v)


# ----------------------------------------------------------------------------
# Median selection networks (pure VPU min/max, no sort).
# ----------------------------------------------------------------------------
def _cswap(a, b):
    return jnp.minimum(a, b), jnp.maximum(a, b)


def _median9(vals):
    """Median of 9 via the 19-compare-exchange network (Paeth / Devillard)."""
    p = list(vals)

    def cs(i, j):
        p[i], p[j] = _cswap(p[i], p[j])

    cs(1, 2); cs(4, 5); cs(7, 8)
    cs(0, 1); cs(3, 4); cs(6, 7)
    cs(1, 2); cs(4, 5); cs(7, 8)
    cs(0, 3); cs(5, 8); cs(4, 7)
    cs(3, 6); cs(1, 4); cs(2, 5)
    cs(4, 7); cs(4, 2); cs(6, 4)
    cs(4, 2)
    return p[4]


def _kth_smallest(vals, r):
    """r-th smallest (1-indexed) via a small partial selection network."""
    s = list(vals[:r])
    # Insertion-sort the first r values (ascending).
    for i in range(1, r):
        for j in range(i, 0, -1):
            s[j - 1], s[j] = _cswap(s[j - 1], s[j])
    # Bubble each remaining value through; the running max falls off the top,
    # keeping s = the r smallest seen so far, sorted ascending.
    for x in vals[r:]:
        for i in range(r):
            s[i], x = _cswap(s[i], x)
    return s[r - 1]


def _lower_median(vals):
    """torch.median semantics: lower of the two middle values for even K."""
    K = len(vals)
    if K == 1:
        return vals[0]
    if K == 9:
        return _median9(vals)
    return _kth_smallest(vals, (K + 1) // 2)


def _network_ops(K):
    if K <= 1:
        return 1
    if K == 9:
        return 2 * 19
    r = (K + 1) // 2
    return 2 * (r * (r - 1) // 2 + (K - r) * r)


# ----------------------------------------------------------------------------
# Kernel: one (row tile, channel tile) slab per grid step.
# ----------------------------------------------------------------------------
def _median_pool_kernel(x_ref, o_ref, *, kh, kw, sh, sw):
    # x_ref: (1, th_in, Wp, TC)   o_ref: (1, th_out, Wo, TC)
    _, th_out, wo, _ = o_ref.shape
    x = x_ref[0]
    tc = x.shape[2]

    # K shifted/strided taps, each (th_out, wo, tc). Lane dim (channels) is
    # never sliced; shifts hit only the leading / sublane axes.
    taps = []
    for di in range(kh):
        for dj in range(kw):
            taps.append(
                jax.lax.slice(
                    x,
                    (di, dj, 0),
                    (di + (th_out - 1) * sh + 1, dj + (wo - 1) * sw + 1, tc),
                    (sh, sw, 1),
                )
            )

    # TODO(synk): windows containing NaN follow jnp.minimum/maximum NaN
    # propagation rather than torch.median's sort-NaN-last behavior.
    o_ref[0] = _lower_median(taps).astype(o_ref.dtype)


# ----------------------------------------------------------------------------
# Wrapper.
# ----------------------------------------------------------------------------
def median_pool2d(x, kernel_size=3, stride=1, padding=0, same=False,
                  max_rows_per_tile=None):
    """JAX/Pallas equivalent of MedianPool2d.forward for NCHW input."""
    kh, kw = _pair(kernel_size)
    sh, sw = _pair(stride)
    N, C, H, W = x.shape

    # Padding selection (matches MedianPool2d._padding).
    if same:
        ph = max(kh - sh, 0) if H % sh == 0 else max(kh - H % sh, 0)
        pw = max(kw - sw, 0) if W % sw == 0 else max(kw - W % sw, 0)
        pad_l, pad_r = pw // 2, pw - pw // 2
        pad_t, pad_b = ph // 2, ph - ph // 2
    else:
        pad_l, pad_r, pad_t, pad_b = _quadruple(padding)

    # Reflect pad on H, W (matches F.pad(mode='reflect')).
    if pad_l or pad_r or pad_t or pad_b:
        x = jnp.pad(x, ((0, 0), (0, 0), (pad_t, pad_b), (pad_l, pad_r)),
                    mode="reflect")

    Hp, Wp = H + pad_t + pad_b, W + pad_l + pad_r
    Ho = (Hp - kh) // sh + 1
    Wo = (Wp - kw) // sw + 1
    NC = N * C
    K = kh * kw
    bpp = jnp.dtype(x.dtype).itemsize

    # Lane-dense (channels-last) layout: (Hp, Wp, N*C).
    xcl = jnp.transpose(x.reshape(NC, Hp, Wp), (1, 2, 0))

    # Channel tile: full extent if it fits one lane row, else 128-lane tiles.
    if NC <= 128:
        tc = NC
    else:
        tc = 128
        nc_pad = pl.cdiv(NC, tc) * tc
        if nc_pad != NC:
            xcl = jnp.pad(xcl, ((0, 0), (0, 0), (0, nc_pad - NC)))
    nc_pad = xcl.shape[-1]
    n_ctiles = nc_pad // tc

    # Output-row tile: largest tile whose footprint (double-buffered input and
    # output + K live taps) fits a conservative VMEM budget (v7x-safe).
    budget = 16 * 1024 * 1024
    per_row = bpp * tc * (2 * sh * Wp + (K + 4) * Wo)
    fixed = bpp * tc * 2 * kh * Wp
    th_out = max(1, min(Ho, (budget - fixed) // per_row))
    if max_rows_per_tile is not None:
        th_out = max(1, min(th_out, int(max_rows_per_tile)))
    n_tiles = pl.cdiv(Ho, th_out)
    th_in = (th_out - 1) * sh + kh

    # Gather each row tile together with its halo rows. Out-of-range rows are
    # clamped; they only feed output rows of the last tile that get discarded.
    row_idx = (jnp.arange(n_tiles) * (th_out * sh))[:, None] \
        + jnp.arange(th_in)[None, :]
    row_idx = jnp.clip(row_idx, 0, Hp - 1)
    xt = xcl[row_idx]                                 # (n_tiles, th_in, Wp, nc_pad)

    cost = pl.CostEstimate(
        flops=int(_network_ops(K)) * NC * Ho * Wo,
        transcendentals=0,
        bytes_accessed=int(xt.size + n_tiles * th_out * Wo * nc_pad) * bpp,
    )

    kernel = functools.partial(_median_pool_kernel, kh=kh, kw=kw, sh=sh, sw=sw)

    out = pl.pallas_call(
        kernel,
        out_shape=jax.ShapeDtypeStruct((n_tiles, th_out, Wo, nc_pad), x.dtype),
        grid=(n_tiles, n_ctiles),
        in_specs=[pl.BlockSpec((1, th_in, Wp, tc), lambda t, c: (t, 0, 0, c))],
        out_specs=pl.BlockSpec((1, th_out, Wo, tc), lambda t, c: (t, 0, 0, c)),
        compiler_params=pltpu.CompilerParams(
            dimension_semantics=("parallel", "parallel"),
            vmem_limit_bytes=48 * 1024 * 1024,
        ),
        cost_estimate=cost,
    )(xt)

    out = out.reshape(n_tiles * th_out, Wo, nc_pad)[:Ho, :, :NC]
    return jnp.transpose(out, (2, 0, 1)).reshape(N, C, Ho, Wo)


# ----------------------------------------------------------------------------
# Pure-JAX reference (sort-based) reproducing the PyTorch forward.
# ----------------------------------------------------------------------------
def _reference_median_pool2d(x, kernel_size=3, stride=1, padding=0, same=False):
    kh, kw = _pair(kernel_size)
    sh, sw = _pair(stride)
    N, C, H, W = x.shape
    if same:
        ph = max(kh - sh, 0) if H % sh == 0 else max(kh - H % sh, 0)
        pw = max(kw - sw, 0) if W % sw == 0 else max(kw - W % sw, 0)
        pad_l, pad_r = pw // 2, pw - pw // 2
        pad_t, pad_b = ph // 2, ph - ph // 2
    else:
        pad_l, pad_r, pad_t, pad_b = _quadruple(padding)
    if pad_l or pad_r or pad_t or pad_b:
        x = jnp.pad(x, ((0, 0), (0, 0), (pad_t, pad_b), (pad_l, pad_r)),
                    mode="reflect")
    Hp, Wp = x.shape[2], x.shape[3]
    Ho = (Hp - kh) // sh + 1
    Wo = (Wp - kw) // sw + 1
    wins = []
    for di in range(kh):
        for dj in range(kw):
            wins.append(x[:, :, di: di + (Ho - 1) * sh + 1: sh,
                              dj: dj + (Wo - 1) * sw + 1: sw])
    stacked = jnp.stack(wins, axis=-1)                # (N,C,Ho,Wo,K)
    srt = jnp.sort(stacked, axis=-1)
    return srt[..., (kh * kw - 1) // 2]               # torch lower-median


if __name__ == "__main__":
    key = jax.random.PRNGKey(0)
    x = jax.random.normal(key, (2, 4, 16, 16), dtype=jnp.float32)

    # Module defaults: kernel_size=3, stride=1, padding=0, same=False.
    out = jax.block_until_ready(median_pool2d(x))
    ref = _reference_median_pool2d(x)
    assert out.shape == (2, 4, 14, 14), out.shape
    assert jnp.allclose(out, ref), "default config mismatch"

    # 'same' padding + stride 2 (reflect pad + strided sublane windows).
    out2 = jax.block_until_ready(median_pool2d(x, kernel_size=3, stride=2,
                                               same=True))
    ref2 = _reference_median_pool2d(x, kernel_size=3, stride=2, same=True)
    assert out2.shape == ref2.shape and jnp.allclose(out2, ref2), \
        "same/stride config mismatch"

    # Multi-row-tile path (halo handling) + even-K general selection network.
    out3 = jax.block_until_ready(median_pool2d(x, kernel_size=(2, 3), stride=1,
                                               padding=0, max_rows_per_tile=5))
    ref3 = _reference_median_pool2d(x, kernel_size=(2, 3), stride=1, padding=0)
    assert out3.shape == ref3.shape and jnp.allclose(out3, ref3), \
        "row-tiled / even-K config mismatch"

    print("KERNEL_OK")
</pallas_src>

<mosaic_0001>
module attributes {stable_mosaic.version = 11 : i64} {
  func.func @_median_pool_kernel(%arg0: i32, %arg1: i32, %arg2: memref<1x16x16x8xf32, #tpu.memory_space<vmem>>, %arg3: memref<1x14x14x8xf32, #tpu.memory_space<vmem>>) attributes {dimension_semantics = [#tpu.dimension_semantics<parallel>, #tpu.dimension_semantics<parallel>], iteration_bounds = array<i64: 1, 1>, scalar_prefetch = 0 : i64, scratch_operands = 0 : i64, tpu.core_type = #tpu.core_type<tc>, window_params = [{transform_indices = @transform_0, window_bounds = array<i64: 1, 16, 16, 8>}, {transform_indices = @transform_1, window_bounds = array<i64: 1, 14, 14, 8>}]} {
    %c0 = arith.constant 0 : index
    %c0_0 = arith.constant 0 : index
    %c0_1 = arith.constant 0 : index
    %c0_2 = arith.constant 0 : index
    %0 = vector.load %arg2[%c0, %c0_0, %c0_1, %c0_2] : memref<1x16x16x8xf32, #tpu.memory_space<vmem>>, vector<1x16x16x8xf32>
    %1 = vector.shape_cast %0 : vector<1x16x16x8xf32> to vector<16x16x8xf32>
    %2 = vector.extract_strided_slice %1 {offsets = [0, 0, 0], sizes = [14, 14, 8], strides = [1, 1, 1]} : vector<16x16x8xf32> to vector<14x14x8xf32>
    %3 = vector.extract_strided_slice %1 {offsets = [0, 1, 0], sizes = [14, 14, 8], strides = [1, 1, 1]} : vector<16x16x8xf32> to vector<14x14x8xf32>
    %4 = vector.extract_strided_slice %1 {offsets = [0, 2, 0], sizes = [14, 14, 8], strides = [1, 1, 1]} : vector<16x16x8xf32> to vector<14x14x8xf32>
    %5 = vector.extract_strided_slice %1 {offsets = [1, 0, 0], sizes = [14, 14, 8], strides = [1, 1, 1]} : vector<16x16x8xf32> to vector<14x14x8xf32>
    %6 = vector.extract_strided_slice %1 {offsets = [1, 1, 0], sizes = [14, 14, 8], strides = [1, 1, 1]} : vector<16x16x8xf32> to vector<14x14x8xf32>
    %7 = vector.extract_strided_slice %1 {offsets = [1, 2, 0], sizes = [14, 14, 8], strides = [1, 1, 1]} : vector<16x16x8xf32> to vector<14x14x8xf32>
    %8 = vector.extract_strided_slice %1 {offsets = [2, 0, 0], sizes = [14, 14, 8], strides = [1, 1, 1]} : vector<16x16x8xf32> to vector<14x14x8xf32>
    %9 = vector.extract_strided_slice %1 {offsets = [2, 1, 0], sizes = [14, 14, 8], strides = [1, 1, 1]} : vector<16x16x8xf32> to vector<14x14x8xf32>
    %10 = vector.extract_strided_slice %1 {offsets = [2, 2, 0], sizes = [14, 14, 8], strides = [1, 1, 1]} : vector<16x16x8xf32> to vector<14x14x8xf32>
    %11 = arith.minimumf %3, %4 : vector<14x14x8xf32>
    %12 = arith.maximumf %3, %4 : vector<14x14x8xf32>
    %13 = arith.minimumf %6, %7 : vector<14x14x8xf32>
    %14 = arith.maximumf %6, %7 : vector<14x14x8xf32>
    %15 = arith.minimumf %9, %10 : vector<14x14x8xf32>
    %16 = arith.maximumf %9, %10 : vector<14x14x8xf32>
    %17 = arith.minimumf %2, %11 : vector<14x14x8xf32>
    %18 = arith.maximumf %2, %11 : vector<14x14x8xf32>
    %19 = arith.minimumf %5, %13 : vector<14x14x8xf32>
    %20 = arith.maximumf %5, %13 : vector<14x14x8xf32>
    %21 = arith.minimumf %8, %15 : vector<14x14x8xf32>
    %22 = arith.maximumf %8, %15 : vector<14x14x8xf32>
    %23 = arith.minimumf %18, %12 : vector<14x14x8xf32>
    %24 = arith.maximumf %18, %12 : vector<14x14x8xf32>
    %25 = arith.minimumf %20, %14 : vector<14x14x8xf32>
    %26 = arith.maximumf %20, %14 : vector<14x14x8xf32>
    %27 = arith.minimumf %22, %16 : vector<14x14x8xf32>
    %28 = arith.maximumf %22, %16 : vector<14x14x8xf32>
    %29 = arith.maximumf %17, %19 : vector<14x14x8xf32>
    %30 = arith.minimumf %26, %28 : vector<14x14x8xf32>
    %31 = arith.minimumf %25, %27 : vector<14x14x8xf32>
    %32 = arith.maximumf %25, %27 : vector<14x14x8xf32>
    %33 = arith.maximumf %29, %21 : vector<14x14x8xf32>
    %34 = arith.maximumf %23, %31 : vector<14x14x8xf32>
    %35 = arith.minimumf %24, %30 : vector<14x14x8xf32>
    %36 = arith.minimumf %34, %32 : vector<14x14x8xf32>
    %37 = arith.minimumf %36, %35 : vector<14x14x8xf32>
    %38 = arith.maximumf %36, %35 : vector<14x14x8xf32>
    %39 = arith.maximumf %33, %37 : vector<14x14x8xf32>
    %40 = arith.minimumf %39, %38 : vector<14x14x8xf32>
    %c0_3 = arith.constant 0 : index
    %c0_4 = arith.constant 0 : index
    %c0_5 = arith.constant 0 : index
    %c0_6 = arith.constant 0 : index
    %41 = vector.load %arg3[%c0_3, %c0_4, %c0_5, %c0_6] : memref<1x14x14x8xf32, #tpu.memory_space<vmem>>, vector<1x14x14x8xf32>
    %42 = vector.shape_cast %41 : vector<1x14x14x8xf32> to vector<14x14x8xf32>
    %43 = vector.shape_cast %40 : vector<14x14x8xf32> to vector<1x14x14x8xf32>
    tpu.vector_store %arg3[%c0_3, %c0_4, %c0_5, %c0_6], %43 {strides = array<i32>} : memref<1x14x14x8xf32, #tpu.memory_space<vmem>>, vector<1x14x14x8xf32>,
    return
  }
  func.func @transform_0(%arg0: i32, %arg1: i32) -> (i32, i32, i32, i32) {
    %c0_i32 = arith.constant 0 : i32
    %c0_i32_0 = arith.constant 0 : i32
    %c0_i32_1 = arith.constant 0 : i32
    return %arg0, %c0_i32, %c0_i32_0, %arg1 : i32, i32, i32, i32
  }
  func.func @transform_1(%arg0: i32, %arg1: i32) -> (i32, i32, i32, i32) {
    %c0_i32 = arith.constant 0 : i32
    %c0_i32_0 = arith.constant 0 : i32
    %c0_i32_1 = arith.constant 0 : i32
    return %arg0, %c0_i32, %c0_i32_0, %arg1 : i32, i32, i32, i32
  }
}

</mosaic_0001>

<bundles_post_ra>
// kernel: tpu_custom_call.1
= control target key start
LH: loop header
LB: loop body
LE: loop exit
PB: predicated region body
PF: predicated region fallthrough
CT: control target
= control target key end

     0   :  { %vm68_vm0 = vcmask 1046528   ;;  %vm905_vm1 = vcmask 64512   ;;  %vm907_vm2 = vcmask 62464   ;;  %s1758_s0 = inlined_call_operand.vmem [shape: f32[1,16,16,8], index: 0, kind: input, shape index: {}]   ;;  %s1759_s1 = inlined_call_operand.vmem [shape: f32[1,14,14,8], index: 1, kind: output, shape index: {}]  }
   0x1   :  { %v8_v0 = vld [vmem:[%s1758_s0] sm:$0xff]  ;;  %v955_v1 = vld [vmem:[%s1758_s0 + $0x8] sm:$0xff]  ;;  %v10_v2 = vld [vmem:[%s1758_s0 + $0x10] sm:$0xff] }
   0x2   :  { %v963_v3 = vld [vmem:[%s1758_s0 + $0x18] sm:$0xff]  ;;  %v12_v4 = vld [vmem:[%s1758_s0 + $0x20] sm:$0xff]  ;;  %v13_v5 = vld [vmem:[%s1758_s0 + $0x28] sm:$0xff]  ;;  %v69_v6 = vrot.slane %v8_v0, 1  ;;  %v70_v7 = vrot.slane %v955_v1, 1  ;;  %v72_v8 = vrot.slane %v10_v2, 1 }
   0x3   :  { %v73_v9 = vrot.slane %v963_v3, 1  ;;  %v75_v10 = vrot.slane %v12_v4, 1  ;;  %v76_v11 = vrot.slane %v13_v5, 1  ;;  %v985_v35 = vld [vmem:[%s1758_s0 + $0x30] sm:$0xff]  ;;  %v15_v56 = vld [vmem:[%s1758_s0 + $0x38] sm:$0xff] }
   0x4   :  { %v71_v12 = vsel %vm68_vm0, %v69_v6, %v70_v7  ;;  %v140_v13 = vmin.f32 %v955_v1, %v70_v7  ;;  %v168_v14 = vmax.f32 %v955_v1, %v70_v7  ;;  %v78_v47 = vrot.slane %v985_v35, 1 }
   0x5   :  { %v74_v15 = vsel %vm68_vm0, %v72_v8, %v73_v9  ;;  %v77_v16 = vsel %vm68_vm0, %v75_v10, %v76_v11  ;;  %v139_v17 = vmin.f32 %v8_v0, %v71_v12  ;;  %v142_v18 = vmin.f32 %v963_v3, %v73_v9 }
   0x6   :  { %v141_v19 = vmin.f32 %v10_v2, %v74_v15  ;;  %v143_v20 = vmin.f32 %v12_v4, %v77_v16  ;;  %v144_v21 = vmin.f32 %v13_v5, %v76_v11  ;;  %v167_v22 = vmax.f32 %v8_v0, %v71_v12 }
   0x7   :  { %v169_v23 = vmax.f32 %v10_v2, %v74_v15  ;;  %v170_v24 = vmax.f32 %v963_v3, %v73_v9  ;;  %v171_v25 = vmax.f32 %v12_v4, %v77_v16  ;;  %v172_v26 = vmax.f32 %v13_v5, %v76_v11 }
   0x8   :  { %v245_v27 = vrot.slane %v139_v17, 1  ;;  %v246_v28 = vrot.slane %v140_v13, 1  ;;  %v248_v29 = vrot.slane %v141_v19, 1  ;;  %v249_v30 = vrot.slane %v142_v18, 1 }
   0x9   :  { %v251_v31 = vrot.slane %v143_v20, 1  ;;  %v252_v32 = vrot.slane %v144_v21, 1  ;;  %v421_v33 = vrot.slane %v167_v22, 1  ;;  %v980_v34 = vrot.slane %v168_v14, 1 }
   0xa   :  { %v247_v36 = vsel %vm68_vm0, %v245_v27, %v246_v28  ;;  %v250_v37 = vsel %vm68_vm0, %v248_v29, %v249_v30  ;;  %v424_v38 = vrot.slane %v169_v23, 1  ;;  %v425_v39 = vrot.slane %v170_v24, 1 }
   0xb   :  { %v253_v40 = vsel %vm68_vm0, %v251_v31, %v252_v32  ;;  %v315_v41 = vmin.f32 %v8_v0, %v247_v36  ;;  %v990_v42 = vmin.f32 %v10_v2, %v250_v37  ;;  %v343_v43 = vmax.f32 %v8_v0, %v247_v36 }
   0xc   :  { %v345_v44 = vmax.f32 %v10_v2, %v250_v37  ;;  %v347_v45 = vmax.f32 %v12_v4, %v253_v40  ;;  %v423_v46 = vsel %vm68_vm0, %v421_v33, %v980_v34  ;;  %v995_v48 = vmin.f32 %v12_v4, %v253_v40 }
   0xd   :  { %v426_v49 = vsel %vm68_vm0, %v424_v38, %v425_v39  ;;  %v427_v50 = vrot.slane %v171_v25, 1  ;;  %v428_v51 = vrot.slane %v172_v26, 1  ;;  %v491_v52 = vmin.f32 %v343_v43, %v423_v46 }
   0xe   :  { %v998_v53 = vmin.f32 %v345_v44, %v426_v49  ;;  %v1000_v54 = vmax.f32 %v345_v44, %v426_v49  ;;  %v569_v55 = vmax.f32 %v315_v41, %v990_v42  ;;  %v519_v58 = vmax.f32 %v343_v43, %v423_v46 }
   0xf   :  { %v429_v57 = vsel %vm68_vm0, %v427_v50, %v428_v51  ;;  %v316_v59 = vmin.f32 %v955_v1, %v246_v28  ;;  %v1009_v60 = vmin.f32 %v963_v3, %v249_v30  ;;  %v1015_v63 = vmin.f32 %v13_v5, %v252_v32 }
  0x10   :  { %v1011_v61 = vmin.f32 %v347_v45, %v429_v57  ;;  %v1013_v62 = vmax.f32 %v347_v45, %v429_v57  ;;  %v344_v0 = vmax.f32 %v955_v1, %v246_v28  ;;  %v681_v2 = vmax.f32 %v569_v55, %v995_v48  ;;  %v16_v57 = vld [vmem:[%s1758_s0 + $0x40] sm:$0xff] }
  0x11   :  { %v346_v4 = vmax.f32 %v963_v3, %v249_v30  ;;  %v348_v6 = vmax.f32 %v13_v5, %v252_v32  ;;  %v79_v7 = vrot.slane %v15_v56, 1  ;;  %v570_v11 = vmax.f32 %v316_v59, %v1009_v60 }
  0x12   :  { %v597_v8 = vmin.f32 %v1000_v54, %v1013_v62  ;;  %v625_v9 = vmin.f32 %v998_v53, %v1011_v61  ;;  %v653_v10 = vmax.f32 %v998_v53, %v1011_v61  ;;  %v492_v1 = vmin.f32 %v344_v0, %v980_v34 }
  0x13   :  { %v494_v12 = vmin.f32 %v346_v4, %v425_v39  ;;  %v1028_v13 = vmin.f32 %v348_v6, %v428_v51  ;;  %v522_v3 = vmax.f32 %v346_v4, %v425_v39  ;;  %v520_v15 = vmax.f32 %v344_v0, %v980_v34 }
  0x14   :  { %v709_v5 = vmax.f32 %v491_v52, %v625_v9  ;;  %v737_v14 = vmin.f32 %v519_v58, %v597_v8  ;;  %v1031_v16 = vmax.f32 %v348_v6, %v428_v51  ;;  %v80_v19 = vsel %vm68_vm0, %v78_v47, %v79_v7 }
  0x15   :  { %v626_v17 = vmin.f32 %v494_v12, %v1028_v13  ;;  %v654_v18 = vmax.f32 %v494_v12, %v1028_v13  ;;  %v146_v20 = vmin.f32 %v15_v56, %v79_v7  ;;  %v145_v23 = vmin.f32 %v985_v35, %v80_v19 }
  0x16   :  { %v765_v21 = vmin.f32 %v709_v5, %v653_v10  ;;  %v598_v22 = vmin.f32 %v522_v3, %v1031_v16  ;;  %v173_v24 = vmax.f32 %v985_v35, %v80_v19  ;;  %v682_v25 = vmax.f32 %v570_v11, %v1015_v63 }
  0x17   :  { %v710_v26 = vmax.f32 %v492_v1, %v626_v17  ;;  %v174_v27 = vmax.f32 %v15_v56, %v79_v7  ;;  %v255_v28 = vrot.slane %v146_v20, 1  ;;  %v254_v32 = vrot.slane %v145_v23, 1  ;;  %v1086_v1 = vld [vmem:[%s1758_s0 + $0x50] sm:$0xff]  ;;  %v1101_v23 = vld [vmem:[%s1758_s0 + $0x58] sm:$0xff] }
  0x18   :  { %v793_v29 = vmin.f32 %v765_v21, %v737_v14  ;;  %v821_v30 = vmax.f32 %v765_v21, %v737_v14  ;;  %v738_v31 = vmin.f32 %v520_v15, %v598_v22  ;;  %v430_v34 = vrot.slane %v173_v24, 1 }
  0x19   :  { %v766_v33 = vmin.f32 %v710_v26, %v654_v18  ;;  %v431_v36 = vrot.slane %v174_v27, 1  ;;  %v571_v37 = vmax.f32 %v990_v42, %v995_v48  ;;  %v256_v39 = vsel %vm68_vm0, %v254_v32, %v255_v28 }
  0x1a   :  { %v849_v38 = vmax.f32 %v681_v2, %v793_v29  ;;  %v1043_v40 = vmin.f32 %v15_v56, %v255_v28  ;;  %v350_v41 = vmax.f32 %v15_v56, %v255_v28  ;;  %v1046_v45 = vmin.f32 %v985_v35, %v256_v39 }
  0x1b   :  { %v794_v43 = vmin.f32 %v766_v33, %v738_v31  ;;  %v822_v44 = vmax.f32 %v766_v33, %v738_v31  ;;  %v349_v46 = vmax.f32 %v985_v35, %v256_v39  ;;  %v432_v49 = vsel %vm68_vm0, %v430_v34, %v431_v36  ;;  %v17_v35 = vld [vmem:[%s1758_s0 + $0x48] sm:$0xff] }
  0x1c   :  { %v877_v47 = vmin.f32 %v849_v38, %v821_v30  ;;  %v1050_v50 = vmin.f32 %v350_v41, %v431_v36  ;;  %v1052_v51 = vmax.f32 %v350_v41, %v431_v36  ;;  %v572_v56 = vmax.f32 %v1009_v60, %v1015_v63  ;;  %v1107_v30 = vld [vmem:[%s1758_s0 + $0x60] sm:$0xff] }
  0x1d   :  { %v850_v42 = vmax.f32 %v682_v25, %v794_v43  ;;  %v1054_v52 = vmin.f32 %v349_v46, %v432_v49  ;;  %v1056_v55 = vmax.f32 %v349_v46, %v432_v49  ;;  %v683_v58 = vmax.f32 %v571_v37, %v1046_v45 }
  0x1e   :  { %906 = vst.msk [vmem:[%s1759_s1] sm:$0xff] %vm905_vm1, %v877_v47  ;;  %v600_v59 = vmin.f32 %v1031_v16, %v1052_v51  ;;  %v628_v60 = vmin.f32 %v1028_v13, %v1050_v50  ;;  %v656_v0 = vmax.f32 %v1028_v13, %v1050_v50  ;;  %v81_v10 = vrot.slane %v16_v57, 1 }
  0x1f   :  { %v878_v2 = vmin.f32 %v850_v42, %v822_v44  ;;  %v599_v4 = vmin.f32 %v1013_v62, %v1056_v55  ;;  %v627_v6 = vmin.f32 %v1011_v61, %v1054_v52  ;;  %v655_v7 = vmax.f32 %v1011_v61, %v1054_v52 }
  0x20   :  { %v712_v8 = vmax.f32 %v494_v12, %v628_v60  ;;  %v740_v9 = vmin.f32 %v522_v3, %v600_v59  ;;  %v82_v11 = vrot.slane %v17_v35, 1  ;;  %v684_v15 = vmax.f32 %v572_v56, %v1043_v40 }
  0x21   :  { %908 = vst.msk [vmem:[%s1759_s1 + $0x8] sm:$0x3f] %vm907_vm2, %v878_v2  ;;  %v711_v5 = vmax.f32 %v998_v53, %v627_v6  ;;  %v739_v14 = vmin.f32 %v1000_v54, %v599_v4  ;;  %v573_v12 = vmax.f32 %v995_v48, %v1046_v45  ;;  %v84_v53 = vrot.slane %v1086_v1, 1 }
  0x22   :  { %v768_v3 = vmin.f32 %v712_v8, %v656_v0  ;;  %v83_v17 = vsel %vm68_vm0, %v81_v10, %v82_v11  ;;  %v148_v18 = vmin.f32 %v17_v35, %v82_v11  ;;  %v176_v19 = vmax.f32 %v17_v35, %v82_v11 }
  0x23   :  { %v767_v20 = vmin.f32 %v711_v5, %v655_v7  ;;  %v147_v21 = vmin.f32 %v16_v57, %v83_v17  ;;  %v175_v22 = vmax.f32 %v16_v57, %v83_v17  ;;  %v574_v33 = vmax.f32 %v1015_v63, %v1043_v40 }
  0x24   :  { %v796_v54 = vmin.f32 %v768_v3, %v740_v9  ;;  %v824_v24 = vmax.f32 %v768_v3, %v740_v9  ;;  %v258_v25 = vrot.slane %v148_v18, 1  ;;  %v434_v26 = vrot.slane %v176_v19, 1 }
  0x25   :  { %v795_v48 = vmin.f32 %v767_v20, %v739_v14  ;;  %v823_v27 = vmax.f32 %v767_v20, %v739_v14  ;;  %v257_v28 = vrot.slane %v147_v21, 1  ;;  %v433_v29 = vrot.slane %v175_v22, 1 }
  0x26   :  { %v852_v31 = vmax.f32 %v684_v15, %v796_v54  ;;  %v352_v32 = vmax.f32 %v17_v35, %v258_v25  ;;  %v85_v34 = vrot.slane %v1101_v23, 1  ;;  %v1114_v39 = vmin.f32 %v17_v35, %v258_v25 }
  0x27   :  { %v851_v36 = vmax.f32 %v683_v58, %v795_v48  ;;  %v259_v37 = vsel %vm68_vm0, %v257_v28, %v258_v25  ;;  %v435_v38 = vsel %vm68_vm0, %v433_v29, %v434_v26  ;;  %v87_v46 = vrot.slane %v1107_v30, 1  ;;  %v21_v48 = vld [vmem:[%s1758_s0 + $0x68] sm:$0xff] }
  0x28   :  { %v880_v41 = vmin.f32 %v852_v31, %v824_v24  ;;  %v351_v43 = vmax.f32 %v16_v57, %v259_v37  ;;  %v1116_v44 = vmin.f32 %v352_v32, %v434_v26  ;;  %v1119_v49 = vmin.f32 %v16_v57, %v259_v37 }
  0x29   :  { %v879_v47 = vmin.f32 %v851_v36, %v823_v27  ;;  %v1121_v42 = vmax.f32 %v352_v32, %v434_v26  ;;  %v86_v63 = vsel %vm68_vm0, %v84_v53, %v85_v34  ;;  %v686_v59 = vmax.f32 %v574_v33, %v1114_v39 }
  0x2a   :  { %910 = vst.msk [vmem:[%s1759_s1 + $0x18] sm:$0x3f] %vm907_vm2, %v880_v41  ;;  %v1128_v56 = vmin.f32 %v351_v43, %v435_v38  ;;  %v1130_v35 = vmax.f32 %v351_v43, %v435_v38  ;;  %v630_v58 = vmin.f32 %v1050_v50, %v1116_v44  ;;  %v658_v60 = vmax.f32 %v1050_v50, %v1116_v44 }
  0x2b   :  { %909 = vst.msk [vmem:[%s1759_s1 + $0x10] sm:$0xff] %vm905_vm1, %v879_v47  ;;  %v602_v57 = vmin.f32 %v1052_v51, %v1121_v42  ;;  %v149_v0 = vmin.f32 %v1086_v1, %v86_v63  ;;  %v150_v2 = vmin.f32 %v1101_v23, %v85_v34  ;;  %v177_v10 = vmax.f32 %v1086_v1, %v86_v63 }
  0x2c   :  { %v601_v4 = vmin.f32 %v1056_v55, %v1130_v35  ;;  %v629_v6 = vmin.f32 %v1054_v52, %v1128_v56  ;;  %v657_v7 = vmax.f32 %v1054_v52, %v1128_v56  ;;  %v714_v8 = vmax.f32 %v1028_v13, %v630_v58 }
  0x2d   :  { %v742_v9 = vmin.f32 %v1031_v16, %v602_v57  ;;  %v178_v11 = vmax.f32 %v1101_v23, %v85_v34  ;;  %v260_v5 = vrot.slane %v149_v0, 1  ;;  %v261_v17 = vrot.slane %v150_v2, 1 }
  0x2e   :  { %v713_v14 = vmax.f32 %v1011_v61, %v629_v6  ;;  %v741_v15 = vmin.f32 %v1013_v62, %v601_v4  ;;  %v770_v3 = vmin.f32 %v714_v8, %v658_v60  ;;  %v685_v18 = vmax.f32 %v573_v12, %v1119_v49 }
  0x2f   :  { %v436_v19 = vrot.slane %v177_v10, 1  ;;  %v437_v20 = vrot.slane %v178_v11, 1  ;;  %v575_v13 = vmax.f32 %v1046_v45, %v1119_v49  ;;  %v262_v53 = vsel %vm68_vm0, %v260_v5, %v261_v17 }
  0x30   :  { %v769_v21 = vmin.f32 %v713_v14, %v657_v7  ;;  %v798_v16 = vmin.f32 %v770_v3, %v742_v9  ;;  %v826_v22 = vmax.f32 %v770_v3, %v742_v9  ;;  %v1162_v54 = vmin.f32 %v1086_v1, %v262_v53 }
  0x31   :  { %v353_v61 = vmax.f32 %v1086_v1, %v262_v53  ;;  %v438_v62 = vsel %vm68_vm0, %v436_v19, %v437_v20  ;;  %v576_v12 = vmax.f32 %v1043_v40, %v1114_v39  ;;  %v354_v45 = vmax.f32 %v1101_v23, %v261_v17 }
  0x32   :  { %v797_v24 = vmin.f32 %v769_v21, %v741_v15  ;;  %v825_v25 = vmax.f32 %v769_v21, %v741_v15  ;;  %v854_v26 = vmax.f32 %v686_v59, %v798_v16  ;;  %v687_v1 = vmax.f32 %v575_v13, %v1162_v54 }
  0x33   :  { %v1172_v27 = vmin.f32 %v353_v61, %v438_v62  ;;  %v1174_v28 = vmax.f32 %v353_v61, %v438_v62  ;;  %v1178_v29 = vmin.f32 %v1101_v23, %v261_v17  ;;  %v1180_v32 = vmin.f32 %v354_v45, %v437_v20 }
  0x34   :  { %v853_v31 = vmax.f32 %v685_v18, %v797_v24  ;;  %v882_v40 = vmin.f32 %v854_v26, %v826_v22  ;;  %v1182_v33 = vmax.f32 %v354_v45, %v437_v20  ;;  %v88_v38 = vrot.slane %v21_v48, 1 }
  0x35   :  { %v603_v34 = vmin.f32 %v1130_v35, %v1174_v28  ;;  %v631_v36 = vmin.f32 %v1128_v56, %v1172_v27  ;;  %v659_v37 = vmax.f32 %v1128_v56, %v1172_v27  ;;  %v632_v43 = vmin.f32 %v1116_v44, %v1180_v32 }
  0x36   :  { %v881_v41 = vmin.f32 %v853_v31, %v825_v25  ;;  %912 = vst.msk [vmem:[%s1759_s1 + $0x28] sm:$0x3f] %vm907_vm2, %v882_v40  ;;  %v604_v23 = vmin.f32 %v1121_v42, %v1182_v33  ;;  %v660_v47 = vmax.f32 %v1116_v44, %v1180_v32  ;;  %v89_v59 = vsel %vm68_vm0, %v87_v46, %v88_v38 }
  0x37   :  { %v715_v63 = vmax.f32 %v1054_v52, %v631_v36  ;;  %v743_v58 = vmin.f32 %v1056_v55, %v603_v34  ;;  %v152_v57 = vmin.f32 %v21_v48, %v88_v38  ;;  %v716_v60 = vmax.f32 %v1050_v50, %v632_v43 }
  0x38   :  { %911 = vst.msk [vmem:[%s1759_s1 + $0x20] sm:$0xff] %vm905_vm1, %v881_v41  ;;  %v744_v0 = vmin.f32 %v1052_v51, %v604_v23  ;;  %v151_v2 = vmin.f32 %v1107_v30, %v89_v59  ;;  %v179_v52 = vmax.f32 %v1107_v30, %v89_v59  ;;  %v688_v55 = vmax.f32 %v576_v12, %v1178_v29  ;;  %v1272_v23 = vld [vmem:[%s1758_s0 + $0x88] sm:$0xff] }
  0x39   :  { %v771_v4 = vmin.f32 %v715_v63, %v659_v37  ;;  %v180_v6 = vmax.f32 %v21_v48, %v88_v38  ;;  %v264_v7 = vrot.slane %v152_v57, 1  ;;  %v772_v46 = vmin.f32 %v716_v60, %v660_v47 }
  0x3a   :  { %v263_v8 = vrot.slane %v151_v2, 1  ;;  %v439_v9 = vrot.slane %v179_v52, 1  ;;  %v577_v10 = vmax.f32 %v1119_v49, %v1162_v54  ;;  %v578_v51 = vmax.f32 %v1114_v39, %v1178_v29  ;;  %v22_v39 = vld [vmem:[%s1758_s0 + $0x70] sm:$0xff] }
  0x3b   :  { %v799_v11 = vmin.f32 %v771_v4, %v743_v58  ;;  %v827_v5 = vmax.f32 %v771_v4, %v743_v58  ;;  %v440_v50 = vrot.slane %v180_v6, 1  ;;  %v800_v14 = vmin.f32 %v772_v46, %v744_v0 }
  0x3c   :  { %v828_v15 = vmax.f32 %v772_v46, %v744_v0  ;;  %v265_v3 = vsel %vm68_vm0, %v263_v8, %v264_v7  ;;  %v356_v17 = vmax.f32 %v21_v48, %v264_v7  ;;  %v1221_v13 = vmin.f32 %v21_v48, %v264_v7  ;;  %v1250_v48 = vld [vmem:[%s1758_s0 + $0x80] sm:$0xff] }
  0x3d   :  { %v855_v18 = vmax.f32 %v687_v1, %v799_v11  ;;  %v355_v19 = vmax.f32 %v1107_v30, %v265_v3  ;;  %v441_v20 = vsel %vm68_vm0, %v439_v9, %v440_v50  ;;  %v856_v21 = vmax.f32 %v688_v55, %v800_v14 }
  0x3e   :  { %v1224_v49 = vmin.f32 %v1107_v30, %v265_v3  ;;  %v1226_v16 = vmin.f32 %v356_v17, %v440_v50  ;;  %v1228_v22 = vmax.f32 %v356_v17, %v440_v50  ;;  %v690_v12 = vmax.f32 %v578_v51, %v1221_v13  ;;  %v23_v30 = vld [vmem:[%s1758_s0 + $0x78] sm:$0xff] }
  0x3f   :  { %v883_v53 = vmin.f32 %v855_v18, %v827_v5  ;;  %v1233_v61 = vmin.f32 %v355_v19, %v441_v20  ;;  %v1235_v62 = vmax.f32 %v355_v19, %v441_v20  ;;  %v884_v24 = vmin.f32 %v856_v21, %v828_v15 }
  0x40   :  { %v606_v25 = vmin.f32 %v1182_v33, %v1228_v22  ;;  %v634_v26 = vmin.f32 %v1180_v32, %v1226_v16  ;;  %v662_v45 = vmax.f32 %v1180_v32, %v1226_v16  ;;  %v90_v34 = vrot.slane %v22_v39, 1 }
  0x41   :  { %913 = vst.msk [vmem:[%s1759_s1 + $0x30] sm:$0xff] %vm905_vm1, %v883_v53  ;;  %v605_v1 = vmin.f32 %v1174_v28, %v1235_v62  ;;  %v633_v31 = vmin.f32 %v1172_v27, %v1233_v61  ;;  %v661_v40 = vmax.f32 %v1172_v27, %v1233_v61  ;;  %v689_v36 = vmax.f32 %v577_v10, %v1224_v49 }
  0x42   :  { %914 = vst.msk [vmem:[%s1759_s1 + $0x38] sm:$0x3f] %vm907_vm2, %v884_v24  ;;  %v718_v37 = vmax.f32 %v1116_v44, %v634_v26  ;;  %v746_v38 = vmin.f32 %v1121_v42, %v606_v25  ;;  %v91_v41 = vrot.slane %v23_v30, 1  ;;  %v579_v63 = vmax.f32 %v1162_v54, %v1224_v49 }
  0x43   :  { %v717_v43 = vmax.f32 %v1128_v56, %v633_v31  ;;  %v745_v47 = vmin.f32 %v1130_v35, %v605_v1  ;;  %v93_v58 = vrot.slane %v1250_v48, 1  ;;  %v94_v52 = vrot.slane %v1272_v23, 1 }
  0x44   :  { %v774_v59 = vmin.f32 %v718_v37, %v662_v45  ;;  %v92_v44 = vsel %vm68_vm0, %v90_v34, %v91_v41  ;;  %v154_v57 = vmin.f32 %v23_v30, %v91_v41  ;;  %v182_v42 = vmax.f32 %v23_v30, %v91_v41 }
  0x45   :  { %v773_v60 = vmin.f32 %v717_v43, %v661_v40  ;;  %v153_v0 = vmin.f32 %v22_v39, %v92_v44  ;;  %v181_v2 = vmax.f32 %v22_v39, %v92_v44  ;;  %v580_v10 = vmax.f32 %v1178_v29, %v1221_v13 }
  0x46   :  { %v802_v4 = vmin.f32 %v774_v59, %v746_v38  ;;  %v830_v55 = vmax.f32 %v774_v59, %v746_v38  ;;  %v267_v56 = vrot.slane %v154_v57, 1  ;;  %v443_v6 = vrot.slane %v182_v42, 1 }
  0x47   :  { %v801_v35 = vmin.f32 %v773_v60, %v745_v47  ;;  %v829_v7 = vmax.f32 %v773_v60, %v745_v47  ;;  %v266_v46 = vrot.slane %v153_v0, 1  ;;  %v442_v54 = vrot.slane %v181_v2, 1 }
  0x48   :  { %v858_v8 = vmax.f32 %v690_v12, %v802_v4  ;;  %v358_v9 = vmax.f32 %v23_v30, %v267_v56  ;;  %v95_v11 = vsel %vm68_vm0, %v93_v58, %v94_v52  ;;  %v1286_v14 = vmin.f32 %v23_v30, %v267_v56 }
  0x49   :  { %v857_v5 = vmax.f32 %v689_v36, %v801_v35  ;;  %v268_v50 = vsel %vm68_vm0, %v266_v46, %v267_v56  ;;  %v444_v51 = vsel %vm68_vm0, %v442_v54, %v443_v6  ;;  %v155_v18 = vmin.f32 %v1250_v48, %v95_v11  ;;  %v26_v46 = vld [vmem:[%s1758_s0 + $0x90] sm:$0xff] }
  0x4a   :  { %v886_v15 = vmin.f32 %v858_v8, %v830_v55  ;;  %v357_v3 = vmax.f32 %v22_v39, %v268_v50  ;;  %v1288_v17 = vmin.f32 %v358_v9, %v443_v6  ;;  %v1291_v20 = vmin.f32 %v22_v39, %v268_v50 }
  0x4b   :  { %v885_v19 = vmin.f32 %v857_v5, %v829_v7  ;;  %v1293_v21 = vmax.f32 %v358_v9, %v443_v6  ;;  %v156_v29 = vmin.f32 %v1272_v23, %v94_v52  ;;  %v692_v24 = vmax.f32 %v580_v10, %v1286_v14  ;;  %v27_v10 = vld [vmem:[%s1758_s0 + $0x98] sm:$0xff] }
  0x4c   :  { %916 = vst.msk [vmem:[%s1759_s1 + $0x48] sm:$0x3f] %vm907_vm2, %v886_v15  ;;  %v1300_v53 = vmin.f32 %v357_v3, %v444_v51  ;;  %v1302_v12 = vmax.f32 %v357_v3, %v444_v51  ;;  %v636_v30 = vmin.f32 %v1226_v16, %v1288_v17  ;;  %v664_v25 = vmax.f32 %v1226_v16, %v1288_v17  ;;  %v1371_v51 = vld [vmem:[%s1758_s0 + $0xa0] sm:$0xff]  ;;  %v1376_v15 = vld [vmem:[%s1758_s0 + $0xa8] sm:$0xff] }
  0x4d   :  { %915 = vst.msk [vmem:[%s1759_s1 + $0x40] sm:$0xff] %vm905_vm1, %v885_v19  ;;  %v608_v39 = vmin.f32 %v1228_v22, %v1293_v21  ;;  %v183_v26 = vmax.f32 %v1250_v48, %v95_v11  ;;  %v184_v45 = vmax.f32 %v1272_v23, %v94_v52  ;;  %v269_v37 = vrot.slane %v155_v18, 1 }
  0x4e   :  { %v607_v1 = vmin.f32 %v1235_v62, %v1302_v12  ;;  %v635_v31 = vmin.f32 %v1233_v61, %v1300_v53  ;;  %v663_v40 = vmax.f32 %v1233_v61, %v1300_v53  ;;  %v720_v34 = vmax.f32 %v1180_v32, %v636_v30 }
  0x4f   :  { %v748_v36 = vmin.f32 %v1182_v33, %v608_v39  ;;  %v270_v38 = vrot.slane %v156_v29, 1  ;;  %v445_v41 = vrot.slane %v183_v26, 1  ;;  %v446_v59 = vrot.slane %v184_v45, 1 }
  0x50   :  { %v719_v43 = vmax.f32 %v1172_v27, %v635_v31  ;;  %v747_v47 = vmin.f32 %v1174_v28, %v607_v1  ;;  %v776_v58 = vmin.f32 %v720_v34, %v664_v25  ;;  %v691_v44 = vmax.f32 %v579_v63, %v1291_v20 }
  0x51   :  { %v271_v57 = vsel %vm68_vm0, %v269_v37, %v270_v38  ;;  %v360_v42 = vmax.f32 %v1272_v23, %v270_v38  ;;  %v581_v33 = vmax.f32 %v1224_v49, %v1291_v20  ;;  %v447_v27 = vsel %vm68_vm0, %v445_v41, %v446_v59 }
  0x52   :  { %v775_v60 = vmin.f32 %v719_v43, %v663_v40  ;;  %v804_v0 = vmin.f32 %v776_v58, %v748_v36  ;;  %v832_v32 = vmax.f32 %v776_v58, %v748_v36  ;;  %v359_v2 = vmax.f32 %v1250_v48, %v271_v57 }
  0x53   :  { %v1334_v52 = vmin.f32 %v360_v42, %v446_v59  ;;  %v1336_v28 = vmax.f32 %v360_v42, %v446_v59  ;;  %v1339_v56 = vmin.f32 %v1272_v23, %v270_v38  ;;  %v582_v49 = vmax.f32 %v1221_v13, %v1286_v14 }
  0x54   :  { %v803_v4 = vmin.f32 %v775_v60, %v747_v47  ;;  %v831_v63 = vmax.f32 %v775_v60, %v747_v47  ;;  %v860_v55 = vmax.f32 %v692_v24, %v804_v0  ;;  %v1341_v6 = vmin.f32 %v359_v2, %v447_v27 }
  0x55   :  { %v1343_v35 = vmax.f32 %v359_v2, %v447_v27  ;;  %v610_v7 = vmin.f32 %v1293_v21, %v1336_v28  ;;  %v638_v23 = vmin.f32 %v1288_v17, %v1334_v52  ;;  %v666_v9 = vmax.f32 %v1288_v17, %v1334_v52 }
  0x56   :  { %v859_v54 = vmax.f32 %v691_v44, %v803_v4  ;;  %v888_v8 = vmin.f32 %v860_v55, %v832_v32  ;;  %v1360_v13 = vmin.f32 %v1250_v48, %v271_v57  ;;  %v637_v5 = vmin.f32 %v1300_v53, %v1341_v6 }
  0x57   :  { %v609_v11 = vmin.f32 %v1302_v12, %v1343_v35  ;;  %v665_v50 = vmax.f32 %v1300_v53, %v1341_v6  ;;  %v722_v3 = vmax.f32 %v1226_v16, %v638_v23  ;;  %v750_v18 = vmin.f32 %v1228_v22, %v610_v7 }
  0x58   :  { %v887_v48 = vmin.f32 %v859_v54, %v831_v63  ;;  %918 = vst.msk [vmem:[%s1759_s1 + $0x58] sm:$0x3f] %vm907_vm2, %v888_v8  ;;  %v96_v19 = vrot.slane %v26_v46, 1  ;;  %v693_v29 = vmax.f32 %v581_v33, %v1360_v13  ;;  %v721_v30 = vmax.f32 %v1233_v61, %v637_v5 }
  0x59   :  { %v749_v24 = vmin.f32 %v1235_v62, %v609_v11  ;;  %v97_v39 = vrot.slane %v27_v10, 1  ;;  %v694_v25 = vmax.f32 %v582_v49, %v1339_v56  ;;  %v778_v26 = vmin.f32 %v722_v3, %v666_v9 }
  0x5a   :  { %917 = vst.msk [vmem:[%s1759_s1 + $0x50] sm:$0xff] %vm905_vm1, %v887_v48  ;;  %v99_v16 = vrot.slane %v1371_v51, 1  ;;  %v100_v22 = vrot.slane %v1376_v15, 1  ;;  %v777_v45 = vmin.f32 %v721_v30, %v665_v50  ;;  %v583_v42 = vmax.f32 %v1291_v20, %v1360_v13 }
  0x5b   :  { %v98_v1 = vsel %vm68_vm0, %v96_v19, %v97_v39  ;;  %v158_v31 = vmin.f32 %v27_v10, %v97_v39  ;;  %v186_v61 = vmax.f32 %v27_v10, %v97_v39  ;;  %v806_v40 = vmin.f32 %v778_v26, %v750_v18 }
  0x5c   :  { %v834_v62 = vmax.f32 %v778_v26, %v750_v18  ;;  %v157_v34 = vmin.f32 %v26_v46, %v98_v1  ;;  %v185_v36 = vmax.f32 %v26_v46, %v98_v1  ;;  %v805_v37 = vmin.f32 %v777_v45, %v749_v24 }
  0x5d   :  { %v833_v38 = vmax.f32 %v777_v45, %v749_v24  ;;  %v273_v41 = vrot.slane %v158_v31, 1  ;;  %v449_v43 = vrot.slane %v186_v61, 1  ;;  %v862_v47 = vmax.f32 %v694_v25, %v806_v40 }
  0x5e   :  { %v272_v58 = vrot.slane %v157_v34, 1  ;;  %v448_v59 = vrot.slane %v185_v36, 1  ;;  %v101_v44 = vsel %vm68_vm0, %v99_v16, %v100_v22  ;;  %v861_v57 = vmax.f32 %v693_v29, %v805_v37 }
  0x5f   :  { %v362_v60 = vmax.f32 %v27_v10, %v273_v41  ;;  %v159_v0 = vmin.f32 %v1371_v51, %v101_v44  ;;  %v890_v32 = vmin.f32 %v862_v47, %v834_v62  ;;  %v160_v27 = vmin.f32 %v1376_v15, %v100_v22 }
  0x60   :  { %v274_v33 = vsel %vm68_vm0, %v272_v58, %v273_v41  ;;  %v450_v2 = vsel %vm68_vm0, %v448_v59, %v449_v43  ;;  %v889_v4 = vmin.f32 %v861_v57, %v833_v38  ;;  %v584_v49 = vmax.f32 %v1286_v14, %v1339_v56 }
  0x61   :  { %v361_v63 = vmax.f32 %v26_v46, %v274_v33  ;;  %v1402_v55 = vmin.f32 %v362_v60, %v449_v43  ;;  %920 = vst.msk [vmem:[%s1759_s1 + $0x68] sm:$0x3f] %vm907_vm2, %v890_v32  ;;  %v1410_v20 = vmin.f32 %v27_v10, %v273_v41  ;;  %v1412_v7 = vmax.f32 %v362_v60, %v449_v43 }
  0x62   :  { %v187_v54 = vmax.f32 %v1371_v51, %v101_v44  ;;  %v188_v8 = vmax.f32 %v1376_v15, %v100_v22  ;;  %919 = vst.msk [vmem:[%s1759_s1 + $0x60] sm:$0xff] %vm905_vm1, %v889_v4  ;;  %v1420_v23 = vmin.f32 %v26_v46, %v274_v33  ;;  %v275_v50 = vrot.slane %v159_v0, 1 }
  0x63   :  { %v1422_v14 = vmin.f32 %v361_v63, %v450_v2  ;;  %v1424_v9 = vmax.f32 %v361_v63, %v450_v2  ;;  %v640_v10 = vmin.f32 %v1334_v52, %v1402_v55  ;;  %v612_v11 = vmin.f32 %v1336_v28, %v1412_v7 }
  0x64   :  { %v668_v5 = vmax.f32 %v1334_v52, %v1402_v55  ;;  %v276_v48 = vrot.slane %v160_v27, 1  ;;  %v451_v24 = vrot.slane %v187_v54, 1  ;;  %v452_v39 = vrot.slane %v188_v8, 1 }
  0x65   :  { %v611_v3 = vmin.f32 %v1343_v35, %v1424_v9  ;;  %v639_v46 = vmin.f32 %v1341_v6, %v1422_v14  ;;  %v667_v18 = vmax.f32 %v1341_v6, %v1422_v14  ;;  %v724_v19 = vmax.f32 %v1288_v17, %v640_v10 }
  0x66   :  { %v752_v29 = vmin.f32 %v1293_v21, %v612_v11  ;;  %v277_v30 = vsel %vm68_vm0, %v275_v50, %v276_v48  ;;  %v696_v16 = vmax.f32 %v584_v49, %v1410_v20  ;;  %v695_v45 = vmax.f32 %v583_v42, %v1420_v23 }
  0x67   :  { %v723_v25 = vmax.f32 %v1300_v53, %v639_v46  ;;  %v751_v26 = vmin.f32 %v1302_v12, %v611_v3  ;;  %v780_v22 = vmin.f32 %v724_v19, %v668_v5  ;;  %v1446_v1 = vmin.f32 %v1371_v51, %v277_v30 }
  0x68   :  { %v363_v17 = vmax.f32 %v1371_v51, %v277_v30  ;;  %v453_v21 = vsel %vm68_vm0, %v451_v24, %v452_v39  ;;  %v364_v62 = vmax.f32 %v1376_v15, %v276_v48  ;;  %v585_v34 = vmax.f32 %v1360_v13, %v1420_v23  ;;  %v31_v13 = vld [vmem:[%s1758_s0 + $0xb8] sm:$0xff] }
  0x69   :  { %v779_v31 = vmin.f32 %v723_v25, %v667_v18  ;;  %v808_v61 = vmin.f32 %v780_v22, %v752_v29  ;;  %v836_v40 = vmax.f32 %v780_v22, %v752_v29  ;;  %v586_v36 = vmax.f32 %v1339_v56, %v1410_v20  ;;  %v30_v56 = vld [vmem:[%s1758_s0 + $0xb0] sm:$0xff] }
  0x6a   :  { %v1451_v53 = vmin.f32 %v363_v17, %v453_v21  ;;  %v1453_v12 = vmax.f32 %v363_v17, %v453_v21  ;;  %v1459_v41 = vmin.f32 %v364_v62, %v452_v39  ;;  %v1467_v59 = vmax.f32 %v364_v62, %v452_v39 }
  0x6b   :  { %v807_v37 = vmin.f32 %v779_v31, %v751_v26  ;;  %v835_v38 = vmax.f32 %v779_v31, %v751_v26  ;;  %v864_v51 = vmax.f32 %v696_v16, %v808_v61  ;;  %v1482_v33 = vmin.f32 %v1376_v15, %v276_v48 }
  0x6c   :  { %v613_v43 = vmin.f32 %v1424_v9, %v1453_v12  ;;  %v641_v47 = vmin.f32 %v1422_v14, %v1451_v53  ;;  %v669_v58 = vmax.f32 %v1422_v14, %v1451_v53  ;;  %v642_v42 = vmin.f32 %v1402_v55, %v1459_v41 }
  0x6d   :  { %v863_v44 = vmax.f32 %v695_v45, %v807_v37  ;;  %v892_v57 = vmin.f32 %v864_v51, %v836_v40  ;;  %v670_v60 = vmax.f32 %v1402_v55, %v1459_v41  ;;  %v614_v2 = vmin.f32 %v1412_v7, %v1467_v59 }
  0x6e   :  { %v725_v0 = vmax.f32 %v1341_v6, %v641_v47  ;;  %v753_v32 = vmin.f32 %v1343_v35, %v613_v43  ;;  %v726_v4 = vmax.f32 %v1334_v52, %v642_v42  ;;  %v102_v63 = vrot.slane %v30_v56, 1  ;;  %v1502_v52 = vld [vmem:[%s1758_s0 + $0xc0] sm:$0xff] }
  0x6f   :  { %v891_v27 = vmin.f32 %v863_v44, %v835_v38  ;;  %922 = vst.msk [vmem:[%s1759_s1 + $0x78] sm:$0x3f] %vm907_vm2, %v892_v57  ;;  %v103_v49 = vrot.slane %v31_v13, 1  ;;  %v697_v6 = vmax.f32 %v585_v34, %v1446_v1  ;;  %v698_v35 = vmax.f32 %v586_v36, %v1482_v33 }
  0x70   :  { %v781_v54 = vmin.f32 %v725_v0, %v669_v58  ;;  %v754_v15 = vmin.f32 %v1336_v28, %v614_v2  ;;  %v782_v8 = vmin.f32 %v726_v4, %v670_v60  ;;  %v33_v28 = vld [vmem:[%s1758_s0 + $0xc8] sm:$0xff]  ;;  %v105_v26 = vrot.slane %v1502_v52, 1 }
  0x71   :  { %921 = vst.msk [vmem:[%s1759_s1 + $0x70] sm:$0xff] %vm905_vm1, %v891_v27  ;;  %v104_v10 = vsel %vm68_vm0, %v102_v63, %v103_v49  ;;  %v162_v11 = vmin.f32 %v31_v13, %v103_v49  ;;  %v190_v5 = vmax.f32 %v31_v13, %v103_v49  ;;  %v588_v45 = vmax.f32 %v1410_v20, %v1482_v33  ;;  %v1554_v27 = vld [vmem:[%s1758_s0 + $0xd0] sm:$0xff] }
  0x72   :  { %v809_v50 = vmin.f32 %v781_v54, %v753_v32  ;;  %v837_v48 = vmax.f32 %v781_v54, %v753_v32  ;;  %v161_v3 = vmin.f32 %v30_v56, %v104_v10  ;;  %v189_v46 = vmax.f32 %v30_v56, %v104_v10 }
  0x73   :  { %v810_v18 = vmin.f32 %v782_v8, %v754_v15  ;;  %v838_v19 = vmax.f32 %v782_v8, %v754_v15  ;;  %v279_v29 = vrot.slane %v162_v11, 1  ;;  %v455_v30 = vrot.slane %v190_v5, 1 }
  0x74   :  { %v865_v24 = vmax.f32 %v697_v6, %v809_v50  ;;  %v278_v39 = vrot.slane %v161_v3, 1  ;;  %v454_v25 = vrot.slane %v189_v46, 1  ;;  %v106_v17 = vrot.slane %v33_v28, 1 }
  0x75   :  { %v866_v16 = vmax.f32 %v698_v35, %v810_v18  ;;  %v366_v22 = vmax.f32 %v31_v13, %v279_v29  ;;  %v587_v40 = vmax.f32 %v1420_v23, %v1446_v1  ;;  %v1514_v36 = vmin.f32 %v31_v13, %v279_v29 }
  0x76   :  { %v893_v21 = vmin.f32 %v865_v24, %v837_v48  ;;  %v280_v31 = vsel %vm68_vm0, %v278_v39, %v279_v29  ;;  %v456_v61 = vsel %vm68_vm0, %v454_v25, %v455_v30  ;;  %v107_v51 = vsel %vm68_vm0, %v105_v26, %v106_v17 }
  0x77   :  { %v894_v62 = vmin.f32 %v866_v16, %v838_v19  ;;  %v365_v34 = vmax.f32 %v30_v56, %v280_v31  ;;  %v1516_v37 = vmin.f32 %v366_v22, %v455_v30  ;;  %v1522_v20 = vmin.f32 %v30_v56, %v280_v31  ;;  %v35_v19 = vld [vmem:[%s1758_s0 + $0xd8] sm:$0xff] }
  0x78   :  { %923 = vst.msk [vmem:[%s1759_s1 + $0x80] sm:$0xff] %vm905_vm1, %v893_v21  ;;  %v1524_v38 = vmax.f32 %v366_v22, %v455_v30  ;;  %v164_v43 = vmin.f32 %v33_v28, %v106_v17  ;;  %v700_v56 = vmax.f32 %v588_v45, %v1514_v36  ;;  %v163_v57 = vmin.f32 %v1502_v52, %v107_v51 }
  0x79   :  { %924 = vst.msk [vmem:[%s1759_s1 + $0x88] sm:$0x3f] %vm907_vm2, %v894_v62  ;;  %v1531_v23 = vmin.f32 %v365_v34, %v456_v61  ;;  %v1533_v47 = vmax.f32 %v365_v34, %v456_v61  ;;  %v644_v58 = vmin.f32 %v1459_v41, %v1516_v37  ;;  %v672_v44 = vmax.f32 %v1459_v41, %v1516_v37 }
  0x7a   :  { %v616_v13 = vmin.f32 %v1467_v59, %v1524_v38  ;;  %v191_v42 = vmax.f32 %v1502_v52, %v107_v51  ;;  %v192_v63 = vmax.f32 %v33_v28, %v106_v17  ;;  %v281_v49 = vrot.slane %v163_v57, 1 }
  0x7b   :  { %v615_v60 = vmin.f32 %v1453_v12, %v1533_v47  ;;  %v643_v0 = vmin.f32 %v1451_v53, %v1531_v23  ;;  %v671_v32 = vmax.f32 %v1451_v53, %v1531_v23  ;;  %v728_v2 = vmax.f32 %v1402_v55, %v644_v58 }
  0x7c   :  { %v756_v4 = vmin.f32 %v1412_v7, %v616_v13  ;;  %v282_v6 = vrot.slane %v164_v43, 1  ;;  %v457_v8 = vrot.slane %v191_v42, 1  ;;  %v699_v10 = vmax.f32 %v587_v40, %v1522_v20 }
  0x7d   :  { %v727_v54 = vmax.f32 %v1422_v14, %v643_v0  ;;  %v755_v35 = vmin.f32 %v1424_v9, %v615_v60  ;;  %v784_v15 = vmin.f32 %v728_v2, %v672_v44  ;;  %v458_v11 = vrot.slane %v192_v63, 1 }
  0x7e   :  { %v283_v55 = vsel %vm68_vm0, %v281_v49, %v282_v6  ;;  %v108_v5 = vrot.slane %v1554_v27, 1  ;;  %v589_v7 = vmax.f32 %v1446_v1, %v1522_v20  ;;  %v1566_v9 = vmin.f32 %v33_v28, %v282_v6 }
  0x7f   :  { %v783_v50 = vmin.f32 %v727_v54, %v671_v32  ;;  %v812_v48 = vmin.f32 %v784_v15, %v756_v4  ;;  %v840_v3 = vmax.f32 %v784_v15, %v756_v4  ;;  %v367_v46 = vmax.f32 %v1502_v52, %v283_v55 }
  0x80   :  { %v459_v14 = vsel %vm68_vm0, %v457_v8, %v458_v11  ;;  %v368_v18 = vmax.f32 %v33_v28, %v282_v6  ;;  %v1572_v39 = vmin.f32 %v1502_v52, %v283_v55  ;;  %v590_v45 = vmax.f32 %v1482_v33, %v1514_v36 }
  0x81   :  { %v811_v29 = vmin.f32 %v783_v50, %v755_v35  ;;  %v839_v30 = vmax.f32 %v783_v50, %v755_v35  ;;  %v868_v24 = vmax.f32 %v700_v56, %v812_v48  ;;  %v1574_v25 = vmin.f32 %v367_v46, %v459_v14 }
  0x82   :  { %v1576_v1 = vmax.f32 %v367_v46, %v459_v14  ;;  %v1578_v26 = vmin.f32 %v368_v18, %v458_v11  ;;  %v1580_v16 = vmax.f32 %v368_v18, %v458_v11  ;;  %v109_v17 = vrot.slane %v35_v19, 1 }
  0x83   :  { %v867_v22 = vmax.f32 %v699_v10, %v811_v29  ;;  %v896_v28 = vmin.f32 %v868_v24, %v840_v3  ;;  %v645_v52 = vmin.f32 %v1531_v23, %v1574_v25  ;;  %v673_v31 = vmax.f32 %v1531_v23, %v1574_v25 }
  0x84   :  { %v617_v21 = vmin.f32 %v1533_v47, %v1576_v1  ;;  %v618_v61 = vmin.f32 %v1524_v38, %v1580_v16  ;;  %v646_v33 = vmin.f32 %v1516_v37, %v1578_v26  ;;  %v674_v62 = vmax.f32 %v1516_v37, %v1578_v26 }
  0x85   :  { %v895_v40 = vmin.f32 %v867_v22, %v839_v30  ;;  %926 = vst.msk [vmem:[%s1759_s1 + $0x98] sm:$0x3f] %vm907_vm2, %v896_v28  ;;  %v110_v34 = vsel %vm68_vm0, %v108_v5, %v109_v17  ;;  %v729_v51 = vmax.f32 %v1451_v53, %v645_v52  ;;  %v166_v44 = vmin.f32 %v35_v19, %v109_v17  ;;  %v1614_v53 = vld [vmem:[%s1758_s0 + $0xe0] sm:$0xff] }
  0x86   :  { %v757_v43 = vmin.f32 %v1453_v12, %v617_v21  ;;  %v758_v58 = vmin.f32 %v1467_v59, %v618_v61  ;;  %v165_v56 = vmin.f32 %v1554_v27, %v110_v34  ;;  %v730_v13 = vmax.f32 %v1459_v41, %v646_v33  ;;  %v1619_v12 = vld [vmem:[%s1758_s0 + $0xe8] sm:$0xff] }
  0x87   :  { %925 = vst.msk [vmem:[%s1759_s1 + $0x90] sm:$0xff] %vm905_vm1, %v895_v40  ;;  %v193_v57 = vmax.f32 %v1554_v27, %v110_v34  ;;  %v194_v42 = vmax.f32 %v35_v19, %v109_v17  ;;  %v701_v59 = vmax.f32 %v589_v7, %v1572_v39  ;;  %v785_v60 = vmin.f32 %v729_v51, %v673_v31 }
  0x88   :  { %v702_v0 = vmax.f32 %v590_v45, %v1566_v9  ;;  %v284_v41 = vrot.slane %v165_v56, 1  ;;  %v786_v32 = vmin.f32 %v730_v13, %v674_v62  ;;  %v285_v2 = vrot.slane %v166_v44, 1 }
  0x89   :  { %v460_v4 = vrot.slane %v193_v57, 1  ;;  %v461_v63 = vrot.slane %v194_v42, 1  ;;  %v813_v49 = vmin.f32 %v785_v60, %v757_v43  ;;  %v841_v6 = vmax.f32 %v785_v60, %v757_v43 }
  0x8a   :  { %v197_v54 = vrot.slane %v1614_v53, 1  ;;  %v198_v35 = vrot.slane %v1619_v12, 1  ;;  %v814_v15 = vmin.f32 %v786_v32, %v758_v58  ;;  %v842_v8 = vmax.f32 %v786_v32, %v758_v58 }
  0x8b   :  { %v286_v10 = vsel %vm68_vm0, %v284_v41, %v285_v2  ;;  %v462_v55 = vsel %vm68_vm0, %v460_v4, %v461_v63  ;;  %v869_v11 = vmax.f32 %v701_v59, %v813_v49  ;;  %v591_v50 = vmax.f32 %v1522_v20, %v1572_v39 }
  0x8c   :  { %v369_v5 = vmax.f32 %v1554_v27, %v286_v10  ;;  %v592_v48 = vmax.f32 %v1514_v36, %v1566_v9  ;;  %v870_v3 = vmax.f32 %v702_v0, %v814_v15  ;;  %v1633_v7 = vmin.f32 %v1554_v27, %v286_v10  ;;  %v1698_v10 = vld [vmem:[%s1758_s0 + $0xf0] sm:$0xff] }
  0x8d   :  { %v370_v46 = vmax.f32 %v35_v19, %v285_v2  ;;  %v199_v14 = vsel %vm68_vm0, %v197_v54, %v198_v35  ;;  %v897_v18 = vmin.f32 %v869_v11, %v841_v6  ;;  %v1640_v24 = vmin.f32 %v35_v19, %v285_v2 }
  0x8e   :  { %v1636_v29 = vmin.f32 %v369_v5, %v462_v55  ;;  %v1638_v30 = vmax.f32 %v369_v5, %v462_v55  ;;  %v898_v22 = vmin.f32 %v870_v3, %v842_v8  ;;  %v203_v36 = vmin.f32 %v1619_v12, %v198_v35  ;;  %v39_v55 = vld [vmem:[%s1758_s0 + $0xf8] sm:$0xff] }
  0x8f   :  { %v1642_v28 = vmin.f32 %v370_v46, %v461_v63  ;;  %v1644_v20 = vmax.f32 %v370_v46, %v461_v63  ;;  %927 = vst.msk [vmem:[%s1759_s1 + $0xa0] sm:$0xff] %vm905_vm1, %v897_v18  ;;  %v202_v17 = vmin.f32 %v1614_v53, %v199_v14  ;;  %v204_v61 = vmax.f32 %v1614_v53, %v199_v14 }
  0x90   :  { %v619_v27 = vmin.f32 %v1576_v1, %v1638_v30  ;;  %v647_v45 = vmin.f32 %v1574_v25, %v1636_v29  ;;  %v675_v19 = vmax.f32 %v1574_v25, %v1636_v29  ;;  %928 = vst.msk [vmem:[%s1759_s1 + $0xa8] sm:$0x3f] %vm907_vm2, %v898_v22  ;;  %v205_v62 = vmax.f32 %v1619_v12, %v198_v35 }
  0x91   :  { %v620_v21 = vmin.f32 %v1580_v16, %v1644_v20  ;;  %v648_v52 = vmin.f32 %v1578_v26, %v1642_v28  ;;  %v676_v31 = vmax.f32 %v1578_v26, %v1642_v28  ;;  %v373_v34 = vrot.slane %v202_v17, 1 }
  0x92   :  { %v731_v40 = vmax.f32 %v1531_v23, %v647_v45  ;;  %v759_v33 = vmin.f32 %v1533_v47, %v619_v27  ;;  %v374_v58 = vrot.slane %v203_v36, 1  ;;  %v549_v56 = vrot.slane %v204_v61, 1 }
  0x93   :  { %v732_v51 = vmax.f32 %v1516_v37, %v648_v52  ;;  %v760_v43 = vmin.f32 %v1524_v38, %v620_v21  ;;  %v703_v13 = vmax.f32 %v591_v50, %v1633_v7  ;;  %v704_v57 = vmax.f32 %v592_v48, %v1640_v24 }
  0x94   :  { %v787_v44 = vmin.f32 %v731_v40, %v675_v19  ;;  %v550_v42 = vrot.slane %v205_v62, 1  ;;  %v375_v23 = vsel %vm68_vm0, %v373_v34, %v374_v58  ;;  %v593_v47 = vmax.f32 %v1572_v39, %v1633_v7 }
  0x95   :  { %v788_v59 = vmin.f32 %v732_v51, %v676_v31  ;;  %v381_v60 = vmax.f32 %v1619_v12, %v374_v58  ;;  %v380_v38 = vmax.f32 %v1614_v53, %v375_v23  ;;  %v594_v41 = vmax.f32 %v1566_v9, %v1640_v24 }
  0x96   :  { %v815_v0 = vmin.f32 %v787_v44, %v759_v33  ;;  %v843_v37 = vmax.f32 %v787_v44, %v759_v33  ;;  %v551_v4 = vsel %vm68_vm0, %v549_v56, %v550_v42  ;;  %v1689_v39 = vmin.f32 %v1619_v12, %v374_v58 }
  0x97   :  { %v816_v32 = vmin.f32 %v788_v59, %v760_v43  ;;  %v844_v2 = vmax.f32 %v788_v59, %v760_v43  ;;  %v1684_v63 = vmin.f32 %v381_v60, %v550_v42  ;;  %v1686_v6 = vmin.f32 %v380_v38, %v551_v4 }
  0x98   :  { %v871_v49 = vmax.f32 %v703_v13, %v815_v0  ;;  %v556_v54 = vmax.f32 %v380_v38, %v551_v4  ;;  %v557_v15 = vmax.f32 %v381_v60, %v550_v42  ;;  %v378_v3 = vmin.f32 %v1614_v53, %v375_v23 }
  0x99   :  { %v872_v35 = vmax.f32 %v704_v57, %v816_v32  ;;  %v650_v8 = vmin.f32 %v1642_v28, %v1684_v63  ;;  %v678_v9 = vmax.f32 %v1642_v28, %v1684_v63  ;;  %v649_v5 = vmin.f32 %v1636_v29, %v1686_v6 }
  0x9a   :  { %v899_v11 = vmin.f32 %v871_v49, %v843_v37  ;;  %v621_v12 = vmin.f32 %v1638_v30, %v556_v54  ;;  %v677_v50 = vmax.f32 %v1636_v29, %v1686_v6  ;;  %v622_v46 = vmin.f32 %v1644_v20, %v557_v15 }
  0x9b   :  { %v900_v48 = vmin.f32 %v872_v35, %v844_v2  ;;  %v734_v14 = vmax.f32 %v1578_v26, %v650_v8  ;;  %v733_v18 = vmax.f32 %v1574_v25, %v649_v5  ;;  %v208_v36 = vrot.slane %v1698_v10, 1 }
  0x9c   :  { %929 = vst.msk [vmem:[%s1759_s1 + $0xb0] sm:$0xff] %vm905_vm1, %v899_v11  ;;  %v761_v22 = vmin.f32 %v1576_v1, %v621_v12  ;;  %v209_v27 = vrot.slane %v39_v55, 1  ;;  %v705_v53 = vmax.f32 %v593_v47, %v378_v3  ;;  %v706_v26 = vmax.f32 %v594_v41, %v1689_v39 }
  0x9d   :  { %930 = vst.msk [vmem:[%s1759_s1 + $0xb8] sm:$0x3f] %vm907_vm2, %v900_v48  ;;  %v762_v45 = vmin.f32 %v1580_v16, %v622_v46  ;;  %v790_v19 = vmin.f32 %v734_v14, %v678_v9  ;;  %v789_v17 = vmin.f32 %v733_v18, %v677_v50  ;;  %v596_v0 = vmax.f32 %v1640_v24, %v1689_v39 }
  0x9e   :  { %v210_v21 = vsel %vm68_vm0, %v208_v36, %v209_v27  ;;  %v214_v25 = vmin.f32 %v39_v55, %v209_v27  ;;  %v216_v52 = vmax.f32 %v39_v55, %v209_v27  ;;  %v595_v4 = vmax.f32 %v1633_v7, %v378_v3 }
  0x9f   :  { %v818_v1 = vmin.f32 %v790_v19, %v762_v45  ;;  %v846_v31 = vmax.f32 %v790_v19, %v762_v45  ;;  %v213_v61 = vmin.f32 %v1698_v10, %v210_v21  ;;  %v215_v40 = vmax.f32 %v1698_v10, %v210_v21 }
  0xa0   :  { %v817_v33 = vmin.f32 %v789_v17, %v761_v22  ;;  %v845_v62 = vmax.f32 %v789_v17, %v761_v22  ;;  %v385_v34 = vrot.slane %v214_v25, 1  ;;  %v561_v51 = vrot.slane %v216_v52, 1 }
  0xa1   :  { %v874_v43 = vmax.f32 %v706_v26, %v818_v1  ;;  %v384_v58 = vrot.slane %v213_v61, 1  ;;  %v560_v56 = vrot.slane %v215_v40, 1 }
  0xa2   :  { %v873_v16 = vmax.f32 %v705_v53, %v817_v33  ;;  %v392_v13 = vmax.f32 %v39_v55, %v385_v34  ;;  %v390_v41 = vmin.f32 %v39_v55, %v385_v34 }
  0xa3   :  { %v902_v44 = vmin.f32 %v874_v43, %v846_v31  ;;  %v386_v57 = vsel %vm68_vm0, %v384_v58, %v385_v34  ;;  %v562_v42 = vsel %vm68_vm0, %v560_v56, %v561_v51 }
  0xa4   :  { %v901_v59 = vmin.f32 %v873_v16, %v845_v62  ;;  %v391_v23 = vmax.f32 %v1698_v10, %v386_v57  ;;  %v566_v47 = vmin.f32 %v392_v13, %v561_v51  ;;  %v568_v60 = vmax.f32 %v392_v13, %v561_v51 }
  0xa5   :  { %932 = vst.msk [vmem:[%s1759_s1 + $0xc8] sm:$0x3f] %vm907_vm2, %v902_v44  ;;  %v389_v2 = vmin.f32 %v1698_v10, %v386_v57  ;;  %v708_v5 = vmax.f32 %v596_v0, %v390_v41 }
  0xa6   :  { %931 = vst.msk [vmem:[%s1759_s1 + $0xc0] sm:$0xff] %vm905_vm1, %v901_v59  ;;  %v565_v37 = vmin.f32 %v391_v23, %v562_v42  ;;  %v567_v38 = vmax.f32 %v391_v23, %v562_v42  ;;  %v652_v32 = vmin.f32 %v1684_v63, %v566_v47  ;;  %v624_v49 = vmin.f32 %v557_v15, %v568_v60 }
  0xa7   :  { %v680_v35 = vmax.f32 %v1684_v63, %v566_v47  ;;  %v707_v50 = vmax.f32 %v595_v4, %v389_v2 }
  0xa8   :  { %v623_v8 = vmin.f32 %v556_v54, %v567_v38  ;;  %v651_v24 = vmin.f32 %v1686_v6, %v565_v37  ;;  %v679_v39 = vmax.f32 %v1686_v6, %v565_v37  ;;  %v736_v9 = vmax.f32 %v1642_v28, %v652_v32 }
  0xa9   :  { %v764_v11 = vmin.f32 %v1644_v20, %v624_v49 }
  0xaa   :  { %v735_v55 = vmax.f32 %v1636_v29, %v651_v24  ;;  %v763_v12 = vmin.f32 %v1638_v30, %v623_v8  ;;  %v792_v10 = vmin.f32 %v736_v9, %v680_v35 }
  0xac   :  { %v791_v7 = vmin.f32 %v735_v55, %v679_v39  ;;  %v820_v15 = vmin.f32 %v792_v10, %v764_v11  ;;  %v848_v48 = vmax.f32 %v792_v10, %v764_v11 }
  0xae   :  { %v819_v63 = vmin.f32 %v791_v7, %v763_v12  ;;  %v847_v54 = vmax.f32 %v791_v7, %v763_v12  ;;  %v876_v3 = vmax.f32 %v708_v5, %v820_v15 }
  0xb0   :  { %v875_v46 = vmax.f32 %v707_v50, %v819_v63  ;;  %v904_v14 = vmin.f32 %v876_v3, %v848_v48 }
  0xb2   :  { %v903_v6 = vmin.f32 %v875_v46, %v847_v54  ;;  %934 = vst.msk [vmem:[%s1759_s1 + $0xd8] sm:$0x3f] %vm907_vm2, %v904_v14 }
  0xb4   :  { %933 = vst.msk [vmem:[%s1759_s1 + $0xd0] sm:$0xff] %vm905_vm1, %v903_v6 }

</bundles_post_ra>
